<compile_context>
chip_gen: v7x
topology: tpu7x:2x2x1
jax: 0.10.0
libtpu: 0.0.40
codegen_flags: <defaults>
</compile_context>

<pallas_src>
import math
import numpy as np
import jax
import jax.numpy as jnp
from jax.experimental import pallas as pl
from jax.experimental.pallas import tpu as pltpu

# ----------------------------------------------------------------------------
# Deterministic layered DAG (replaces networkx DiGraph + longest_path /
# push_sources: layers are given directly, predecessors listed per node).
# ----------------------------------------------------------------------------
LAYERS = [
    [0, 1, 2, 3],          # L[0]  sources  -> in_features = 4
    [4, 5, 6, 7, 8, 9],    # L[1]
    [10, 11, 12],          # L[2]
    [13, 14, 15],          # L[3]  sinks    -> out_features = 3
]
PREDS = {
    4: [0, 1], 5: [1, 2], 6: [2, 3], 7: [0, 3], 8: [0, 1, 2, 3], 9: [3],
    10: [4, 5, 6], 11: [1, 6, 7, 8], 12: [8, 9],
    13: [10, 11], 14: [9, 11, 12], 15: [10, 12],
}
SOURCES = LAYERS[0]
SINKS = LAYERS[-1]
N_NODES = 16
BIAS = True
N_STAGES = len(LAYERS) - 1

N_PAD = 128          # lane-padded node axis
N_SRC_PAD = 8        # source (in_features) axis padded to one sublane tile
ONE_LANE = N_NODES   # lane 16: constant-1 "bias node" living in the lane padding
DEFAULT_BATCH_TILE = 512  # multiple of MXU height on v5e(128)/v6e/v7x(256)


# ----------------------------------------------------------------------------
# Parameter construction (mirrors ForWard.__init__: masked W per layer,
# kaiming_uniform(a=sqrt(5)) per-column => U(-1/sqrt(fan_in), 1/sqrt(fan_in)),
# bias row U(-1/sqrt(fan_in), 1/sqrt(fan_in)).  Deterministic via PRNGKey.
# ----------------------------------------------------------------------------
def build_stages(key):
    stages = []
    for layer in LAYERS[1:]:
        preds = sorted(set().union(*[set(PREDS[v]) for v in layer]))
        rows = len(preds) + (1 if BIAS else 0)
        W = np.zeros((rows, len(layer)), dtype=np.float32)
        M = np.zeros_like(W)
        for j, v in enumerate(layer):
            for p in PREDS[v]:
                M[preds.index(p), j] = 1.0
        for j, v in enumerate(layer):
            fan_in = int(M[:, j].sum())
            bound = 1.0 / math.sqrt(fan_in) if fan_in > 0 else 0.0
            key, k1, k2 = jax.random.split(key, 3)
            wcol = np.asarray(
                jax.random.uniform(k1, (fan_in,), minval=-bound, maxval=bound),
                dtype=np.float32)
            W[M[:, j].astype(bool), j] = wcol
            if BIAS:
                M[-1, j] = 1.0
                W[-1, j] = float(
                    jax.random.uniform(k2, (), minval=-bound, maxval=bound))
        stages.append((layer, preds, W, M))
    return stages


def densify(stages, dtype=jnp.float32):
    """Embed each (preds+1, |layer|) masked weight into a dense (N_PAD, N_PAD)
    slab, bias row folded onto the constant-1 lane's row.  -> (S, N_PAD, N_PAD).
    Pass dtype=jnp.bfloat16 for production (halves weight DMA, fewer MXU passes);
    keep f32 for the 1e-5 unit test."""
    S = len(stages)
    Wfull = np.zeros((S, N_PAD, N_PAD), np.float32)
    for s, (layer, preds, W, M) in enumerate(stages):
        MW = M * W
        for j, v in enumerate(layer):
            for pi, p in enumerate(preds):
                Wfull[s, p, v] = MW[pi, j]
            if BIAS:
                Wfull[s, ONE_LANE, v] = MW[-1, j]   # bias via constant-1 lane
    return jnp.asarray(Wfull, dtype=dtype)


def build_source_embed():
    """(N_SRC_PAD, N_PAD) scatter matrix: x @ E puts source i onto lane SOURCES[i]."""
    E = np.zeros((N_SRC_PAD, N_PAD), np.float32)
    for i, v in enumerate(SOURCES):
        E[i, v] = 1.0
    return jnp.asarray(E)


# ----------------------------------------------------------------------------
# Pallas kernel: one batch tile per grid step; all stages unrolled in-kernel.
# ----------------------------------------------------------------------------
def dag_ff_kernel(x_ref, emb_ref, w_ref, out_ref):
    tb = x_ref.shape[0]
    # In-kernel input staging: scatter sources onto their lanes (tiny constant
    # matmul) and set the constant-1 bias lane via iota — no wrapper-side slab.
    lane = jax.lax.broadcasted_iota(jnp.int32, (tb, N_PAD), 1)
    bias_lane = jnp.where(lane == ONE_LANE, 1.0, 0.0).astype(jnp.float32)
    act = jnp.dot(x_ref[...], emb_ref[...],
                  preferred_element_type=jnp.float32) + bias_lane
    # Static unroll: LLO scheduler sees every stage matmul back-to-back.
    for s in range(N_STAGES):
        z = jnp.dot(act.astype(w_ref.dtype), w_ref[s],
                    preferred_element_type=jnp.float32)
        # dropout p=0.0 -> identity
        # TODO(synk): nonzero dropout (pltpu.prng_seed + stateful_bernoulli mask)
        act = act + jnp.maximum(z, 0.0)   # relu; non-layer lanes add exactly 0
    out_ref[...] = act                    # full lane-dense 128-lane slab


def _round_up(n, m):
    return ((n + m - 1) // m) * m


def dag_forward_pallas(x, Wstack, Emb, batch_tile=DEFAULT_BATCH_TILE):
    """x: (B, in_features) f32.  Returns the full (B_pad, N_PAD) activation
    slab; caller slices [:B, SINKS] (keep output lane-dense in the kernel)."""
    B, n_src = x.shape
    tb = min(batch_tile, _round_up(B, 8))
    bp = _round_up(B, tb)
    # Single pad op: batch -> multiple of the tile, sources -> one sublane tile.
    x_pad = jnp.pad(x.astype(jnp.float32),
                    ((0, bp - B), (0, N_SRC_PAD - n_src)))
    return pl.pallas_call(
        dag_ff_kernel,
        out_shape=jax.ShapeDtypeStruct((bp, N_PAD), jnp.float32),
        grid_spec=pltpu.PrefetchScalarGridSpec(
            num_scalar_prefetch=0,
            grid=(bp // tb,),
            in_specs=[
                # per-tile activation input (narrow: 8 lanes of sources)
                pl.BlockSpec((tb, N_SRC_PAD), lambda i: (i, 0)),
                # source-scatter matrix: resident across all batch tiles
                pl.BlockSpec((N_SRC_PAD, N_PAD), lambda i: (0, 0)),
                # whole stage weight stack: DMA'd once, reused by every tile
                pl.BlockSpec((N_STAGES, N_PAD, N_PAD), lambda i: (0, 0, 0)),
            ],
            out_specs=pl.BlockSpec((tb, N_PAD), lambda i: (i, 0)),
        ),
        compiler_params=pltpu.CompilerParams(
            dimension_semantics=("parallel",)),   # megacore sharding on v7x
    )(x_pad, Emb, Wstack)


# ----------------------------------------------------------------------------
# Pure-numpy reference (mirrors ForWard.forward exactly, stand_alone=False).
# ----------------------------------------------------------------------------
def reference_forward(x, stages):
    B = x.shape[0]
    act = np.zeros((B, N_NODES), np.float32)
    act[:, SOURCES] = x
    for (layer, preds, W, M) in stages:
        inp = np.concatenate([act[:, preds], np.ones((B, 1), np.float32)], axis=1)
        out = inp @ (M * W)
        out = np.maximum(out, 0.0)
        act[:, layer] = out
    return act[:, SINKS]


# ----------------------------------------------------------------------------
if __name__ == "__main__":
    key = jax.random.PRNGKey(0)
    kp, kx = jax.random.split(key)

    stages = build_stages(kp)
    Wstack = densify(stages, dtype=jnp.float32)   # bf16 for production batches
    Emb = build_source_embed()

    batch = 2
    x = jax.random.normal(kx, (batch, len(SOURCES)), dtype=jnp.float32)

    # One jit around pad + kernel + slice: weights stay device-resident across
    # repeated calls (no per-call host glue around the ~1 us kernel).
    fwd = jax.jit(dag_forward_pallas)

    full_act = jax.block_until_ready(fwd(x, Wstack, Emb))
    out = np.asarray(full_act)[:batch][:, SINKS]

    ref = reference_forward(np.asarray(x), stages)
    if not np.allclose(out, ref, atol=1e-5, rtol=1e-5):
        raise AssertionError(f"mismatch:\n{out}\nvs\n{ref}")

    print("KERNEL_OK")
</pallas_src>

<mosaic_0001>
module attributes {stable_mosaic.version = 11 : i64} {
  func.func @dag_ff_kernel(%arg0: i32, %arg1: memref<8x8xf32, #tpu.memory_space<vmem>>, %arg2: memref<8x128xf32, #tpu.memory_space<vmem>>, %arg3: memref<3x128x128xf32, #tpu.memory_space<vmem>>, %arg4: memref<8x128xf32, #tpu.memory_space<vmem>>) attributes {dimension_semantics = [#tpu.dimension_semantics<parallel>], iteration_bounds = array<i64: 1>, scalar_prefetch = 0 : i64, scratch_operands = 0 : i64, tpu.core_type = #tpu.core_type<tc>, window_params = [{transform_indices = @transform_0, window_bounds = array<i64: 8, 8>}, {pipeline_mode = #tpu.pipeline_mode<synchronous>, transform_indices = @transform_1, window_bounds = array<i64: 8, 128>}, {pipeline_mode = #tpu.pipeline_mode<synchronous>, transform_indices = @transform_2, window_bounds = array<i64: 3, 128, 128>}, {transform_indices = @transform_3, window_bounds = array<i64: 8, 128>}]} {
    %0 = tpu.iota {dimensions = array<i32: 1>} : vector<8x128xi32>
    %c16_i32 = arith.constant 16 : i32
    %1 = vector.broadcast %c16_i32 : i32 to vector<8x128xi32>
    %2 = arith.cmpi eq, %0, %1 : vector<8x128xi32>
    %cst = arith.constant 1.000000e+00 : f32
    %cst_0 = arith.constant 0.000000e+00 : f32
    %3 = vector.broadcast %cst : f32 to vector<8x128xf32>
    %4 = vector.broadcast %cst_0 : f32 to vector<8x128xf32>
    %5 = arith.select %2, %3, %4 : vector<8x128xi1>, vector<8x128xf32>
    %c0 = arith.constant 0 : index
    %c0_1 = arith.constant 0 : index
    %6 = vector.load %arg1[%c0, %c0_1] : memref<8x8xf32, #tpu.memory_space<vmem>>, vector<8x8xf32>
    %c0_2 = arith.constant 0 : index
    %c0_3 = arith.constant 0 : index
    %7 = vector.load %arg2[%c0_2, %c0_3] : memref<8x128xf32, #tpu.memory_space<vmem>>, vector<8x128xf32>
    %cst_4 = arith.constant dense<0.000000e+00> : vector<8x128xf32>
    %8 = tpu.matmul %6, %7, %cst_4 {dimension_numbers = #tpu.dot_dimension_numbers<[1], [0], [0], [1], [0, 0, 1, 1], [], []>} : vector<8x8xf32>, vector<8x128xf32>, vector<8x128xf32> -> vector<8x128xf32>
    %9 = arith.addf %8, %5 : vector<8x128xf32>
    %c0_5 = arith.constant 0 : index
    %c0_6 = arith.constant 0 : index
    %c0_7 = arith.constant 0 : index
    %10 = vector.load %arg3[%c0_5, %c0_6, %c0_7] : memref<3x128x128xf32, #tpu.memory_space<vmem>>, vector<1x128x128xf32>
    %11 = vector.shape_cast %10 : vector<1x128x128xf32> to vector<128x128xf32>
    %cst_8 = arith.constant dense<0.000000e+00> : vector<8x128xf32>
    %12 = tpu.matmul %9, %11, %cst_8 {dimension_numbers = #tpu.dot_dimension_numbers<[1], [0], [0], [1], [0, 0, 1, 1], [], []>} : vector<8x128xf32>, vector<128x128xf32>, vector<8x128xf32> -> vector<8x128xf32>
    %cst_9 = arith.constant 0.000000e+00 : f32
    %13 = vector.broadcast %cst_9 : f32 to vector<8x128xf32>
    %14 = arith.maximumf %12, %13 : vector<8x128xf32>
    %15 = arith.addf %9, %14 : vector<8x128xf32>
    %c1 = arith.constant 1 : index
    %c0_10 = arith.constant 0 : index
    %c0_11 = arith.constant 0 : index
    %16 = vector.load %arg3[%c1, %c0_10, %c0_11] : memref<3x128x128xf32, #tpu.memory_space<vmem>>, vector<1x128x128xf32>
    %17 = vector.shape_cast %16 : vector<1x128x128xf32> to vector<128x128xf32>
    %cst_12 = arith.constant dense<0.000000e+00> : vector<8x128xf32>
    %18 = tpu.matmul %15, %17, %cst_12 {dimension_numbers = #tpu.dot_dimension_numbers<[1], [0], [0], [1], [0, 0, 1, 1], [], []>} : vector<8x128xf32>, vector<128x128xf32>, vector<8x128xf32> -> vector<8x128xf32>
    %cst_13 = arith.constant 0.000000e+00 : f32
    %19 = vector.broadcast %cst_13 : f32 to vector<8x128xf32>
    %20 = arith.maximumf %18, %19 : vector<8x128xf32>
    %21 = arith.addf %15, %20 : vector<8x128xf32>
    %c2 = arith.constant 2 : index
    %c0_14 = arith.constant 0 : index
    %c0_15 = arith.constant 0 : index
    %22 = vector.load %arg3[%c2, %c0_14, %c0_15] : memref<3x128x128xf32, #tpu.memory_space<vmem>>, vector<1x128x128xf32>
    %23 = vector.shape_cast %22 : vector<1x128x128xf32> to vector<128x128xf32>
    %cst_16 = arith.constant dense<0.000000e+00> : vector<8x128xf32>
    %24 = tpu.matmul %21, %23, %cst_16 {dimension_numbers = #tpu.dot_dimension_numbers<[1], [0], [0], [1], [0, 0, 1, 1], [], []>} : vector<8x128xf32>, vector<128x128xf32>, vector<8x128xf32> -> vector<8x128xf32>
    %cst_17 = arith.constant 0.000000e+00 : f32
    %25 = vector.broadcast %cst_17 : f32 to vector<8x128xf32>
    %26 = arith.maximumf %24, %25 : vector<8x128xf32>
    %27 = arith.addf %21, %26 : vector<8x128xf32>
    %c0_18 = arith.constant 0 : index
    %c0_19 = arith.constant 0 : index
    %28 = vector.load %arg4[%c0_18, %c0_19] : memref<8x128xf32, #tpu.memory_space<vmem>>, vector<8x128xf32>
    tpu.vector_store %arg4[%c0_18, %c0_19], %27 {strides = array<i32>} : memref<8x128xf32, #tpu.memory_space<vmem>>, vector<8x128xf32>,
    return
  }
  func.func @transform_0(%arg0: i32) -> (i32, i32) {
    %c0_i32 = arith.constant 0 : i32
    %c0_i32_0 = arith.constant 0 : i32
    return %arg0, %c0_i32 : i32, i32
  }
  func.func @transform_1(%arg0: i32) -> (i32, i32) {
    %c0_i32 = arith.constant 0 : i32
    %c0_i32_0 = arith.constant 0 : i32
    %c0_i32_1 = arith.constant 0 : i32
    return %c0_i32, %c0_i32_0 : i32, i32
  }
  func.func @transform_2(%arg0: i32) -> (i32, i32, i32) {
    %c0_i32 = arith.constant 0 : i32
    %c0_i32_0 = arith.constant 0 : i32
    %c0_i32_1 = arith.constant 0 : i32
    %c0_i32_2 = arith.constant 0 : i32
    return %c0_i32, %c0_i32_0, %c0_i32_1 : i32, i32, i32
  }
  func.func @transform_3(%arg0: i32) -> (i32, i32) {
    %c0_i32 = arith.constant 0 : i32
    %c0_i32_0 = arith.constant 0 : i32
    return %arg0, %c0_i32 : i32, i32
  }
}

</mosaic_0001>

<bundles_post_ra>
// kernel: dag_forward_pallas.1
= control target key start
LH: loop header
LB: loop body
LE: loop exit
PB: predicated region body
PF: predicated region fallthrough
CT: control target
= control target key end

     0   :  { %8 = vsyncpa [#allocation3], 0  ;;  %s773_s0 = inlined_call_operand.vmem [shape: f32[8,8], index: 0, kind: input, shape index: {}]   ;;  %s774_s1 = inlined_call_operand.vmem [shape: f32[8,128], index: 1, kind: input, shape index: {}]   ;;  %s775_s2 = inlined_call_operand.hbm [shape: f32[3,128,128], index: 2, kind: input, shape index: {}]   ;;  %s776_s3 = inlined_call_operand.hbm [shape: f32[8,128], index: 3, kind: output, shape index: {}]  }
   0x1   :  { %9 = vsyncpa [#allocation4], 0  ;;  %s682_s12 = smov [#allocation2]   ;;  %s634_s16 = scalar_lea.hbm %s775_s2, 6144 }
   0x2   :  { %s19_s13 = sshll.u32 %s682_s12, 4  ;;  %p635_p0 = scmp.ne.s32.totalorder %s775_s2, %s634_s16  ;;  %s20_s13 = int_to_ptr.vmem [resolvable:$true] %s19_s13 }
   0x3   :  { %p638_p1 = scmp.lt.u32.totalorder %s634_s16, %s775_s2 }
   0x5   :  { %p640_p2 = pnand %p638_p1, %p635_p0 }
   0x7   :  { %643 = shalt.err (!%p640_p2)
}
   0x8   :  { %s644_s21 = scalar_lea.vmem %s20_s13, 6144  ;;  %p649_p4 = scmp.lt.s32.totalorder %s20_s13, %s20_s13 }
   0x9   :  { %p645_p3 = scmp.ne.s32.totalorder %s20_s13, %s644_s21  ;;  %p650_p5 = scmp.lt.s32.totalorder %s644_s21, %s644_s21 }
   0xb   :  { %p651_p6 = por %p650_p5, %p649_p4 }
   0xd   :  { %p652_p7 = pnand %p651_p6, %p645_p3 }
   0xf   :  { %655 = shalt.err (!%p652_p7)
}
  0x10   :  { %s683_s22 = smov 128   ;;  %s684_s23 = smov 8  }
  0x11   :  { %25 = dma.hbm_to_vmem [thread:$0]  %s775_s2, 6144, %s20_s13, [#allocation3], %s683_s22, %s683_s22, %s684_s23  }
  0x12   :  { %678 = dma.done.wait [#allocation3], 6144  }
  0x13   :  { %679 = vsyncadd [#allocation3], 4294961152  ;;  %v685_v0 = vmov 0.0   ;;  %vm686_vm0 = vmmov 0   ;;  %v687_v1 = vmov 0.0|0.0   ;;  %vm35_vm1 = vcmask 64512  }
  0x14   :  { %445 = vmatprep.subr.mxu0 %v685_v0  ;;  %447 = vmatprep.mubr.msk.f32.mxu0 %vm686_vm0, %v685_v0  ;;  %v34_v2 = vld [vmem:[%s774_s1] sm:$0xff]  ;;  %v109_v4 = vld [vmem:[#allocation2] sm:$0xff]  ;;  %v110_v5 = vld [vmem:[#allocation2 + $0x8] sm:$0xff]  ;;  %v29_v49 = vlaneseq }
  0x15   :  { %555 = vmatprep.subr.bf16.mxu1 %v687_v1  ;;  %482 = vmatprep.mubr.msk.f32.mxu1 %vm686_vm0, %v685_v0  ;;  %v33_v3 = vld [vmem:[%s773_s0] sm:$0xff]  ;;  %v112_v7 = vld [vmem:[#allocation2 + $0x18] sm:$0xff]  ;;  %v556_v8 = vpack.c.bf16 %v110_v5, %v109_v4  ;;  %v113_v10 = vld [vmem:[#allocation2 + $0x20] sm:$0xff]  ;;  %s688_s0 = smov [#allocation5]  }
  0x16   :  { %446 = vmatpush3.msra.mxu0 %v34_v2  ;;  %v111_v6 = vld [vmem:[#allocation2 + $0x10] sm:$0xff]  ;;  %v114_v11 = vld [vmem:[#allocation2 + $0x28] sm:$0xff]  ;;  %v116_v14 = vld [vmem:[#allocation2 + $0x38] sm:$0xff]  ;;  %v30_v50 = vand.u32 127, %v29_v49  ;;  %s382_s1 = sshll.u32 %s688_s0, 4  ;;  %s383_s1 = int_to_ptr.vmem [resolvable:$true] %s382_s1 }
  0x17   :  { %448 = vmatmul.mubr.msk.f32.vlgmr.msra.gmra.mrb[0].mxu0 %vm35_vm1, %v33_v3  ;;  %579 = vmatprep.subr.bf16.mxu0 %v687_v1  ;;  %v559_v9 = vpack.c.bf16 %v112_v7, %v111_v6  ;;  %v562_v12 = vpack.c.bf16 %v114_v11, %v113_v10  ;;  %v115_v13 = vld [vmem:[#allocation2 + $0x30] sm:$0xff]  ;;  %v117_v16 = vld [vmem:[#allocation2 + $0x40] sm:$0xff]  ;;  %v118_v17 = vld [vmem:[#allocation2 + $0x48] sm:$0xff]  ;;  %s656_s29 = scalar_lea.vmem %s383_s1, 128  ;;  %p661_p9 = scmp.lt.s32.totalorder %s383_s1, %s383_s1 }
  0x18   :  { %517 = vmatprep.mubr.msk.f32.mxu0 %vm686_vm0, %v685_v0  ;;  %557 = vmatpush3.bf16.msra.mxu1 %v556_v8  ;;  %v565_v15 = vpack.c.bf16 %v116_v14, %v115_v13  ;;  %v568_v18 = vpack.c.bf16 %v118_v17, %v117_v16  ;;  %v119_v19 = vld [vmem:[#allocation2 + $0x50] sm:$0xff]  ;;  %v120_v20 = vld [vmem:[#allocation2 + $0x58] sm:$0xff]  ;;  %v121_v22 = vld [vmem:[#allocation2 + $0x60] sm:$0xff]  ;;  %vm31_vm2 = vcmp.eq.s32.totalorder %v30_v50, 16  ;;  %p657_p8 = scmp.ne.s32.totalorder %s383_s1, %s656_s29  ;;  %p662_p10 = scmp.lt.s32.totalorder %s656_s29, %s656_s29 }
  0x19   :  { %558 = vmatprep.subr.bf16.mxu1 %v687_v1  ;;  %v571_v21 = vpack.c.bf16 %v120_v20, %v119_v19  ;;  %v122_v23 = vld [vmem:[#allocation2 + $0x68] sm:$0xff]  ;;  %v123_v25 = vld [vmem:[#allocation2 + $0x70] sm:$0xff]  ;;  %v124_v26 = vld [vmem:[#allocation2 + $0x78] sm:$0xff]  ;;  %v32_v51 = vsel %vm31_vm2, 1.0, %v685_v0 }
  0x1a   :  { %v574_v24 = vpack.c.bf16 %v122_v23, %v121_v22  ;;  %v577_v27 = vpack.c.bf16 %v124_v26, %v123_v25  ;;  %v198_v28 = vld [vmem:[#allocation2 + $0x80] sm:$0xff]  ;;  %v199_v29 = vld [vmem:[#allocation2 + $0x88] sm:$0xff]  ;;  %v200_v30 = vld [vmem:[#allocation2 + $0x90] sm:$0xff]  ;;  %p663_p11 = por %p662_p10, %p661_p9 }
  0x1b   :  { %v580_v31 = vpack.c.bf16 %v199_v29, %v198_v28  ;;  %v201_v32 = vld [vmem:[#allocation2 + $0x98] sm:$0xff]  ;;  %v202_v34 = vld [vmem:[#allocation2 + $0xa0] sm:$0xff]  ;;  %v203_v35 = vld [vmem:[#allocation2 + $0xa8] sm:$0xff] }
  0x1c   :  { %560 = vmatpush3.bf16.msra.mxu1 %v559_v9  ;;  %v583_v33 = vpack.c.bf16 %v201_v32, %v200_v30  ;;  %v586_v36 = vpack.c.bf16 %v203_v35, %v202_v34  ;;  %v204_v37 = vld [vmem:[#allocation2 + $0xb0] sm:$0xff]  ;;  %v205_v38 = vld [vmem:[#allocation2 + $0xb8] sm:$0xff]  ;;  %v206_v40 = vld [vmem:[#allocation2 + $0xc0] sm:$0xff]  ;;  %p664_p12 = pnand %p663_p11, %p657_p8 }
  0x1d   :  { %561 = vmatprep.subr.bf16.mxu1 %v687_v1  ;;  %581 = vmatpush3.bf16.msra.mxu0 %v580_v31  ;;  %v589_v39 = vpack.c.bf16 %v205_v38, %v204_v37  ;;  %v207_v41 = vld [vmem:[#allocation2 + $0xc8] sm:$0xff]  ;;  %v208_v43 = vld [vmem:[#allocation2 + $0xd0] sm:$0xff]  ;;  %v209_v44 = vld [vmem:[#allocation2 + $0xd8] sm:$0xff] }
  0x1e   :  { %582 = vmatprep.subr.bf16.mxu0 %v687_v1  ;;  %v592_v42 = vpack.c.bf16 %v207_v41, %v206_v40  ;;  %v595_v45 = vpack.c.bf16 %v209_v44, %v208_v43  ;;  %v210_v46 = vld [vmem:[#allocation2 + $0xe0] sm:$0xff]  ;;  %v211_v47 = vld [vmem:[#allocation2 + $0xe8] sm:$0xff]  ;;  %v212_v55 = vld [vmem:[#allocation2 + $0xf0] sm:$0xff] }
  0x1f   :  { %v598_v48 = vpack.c.bf16 %v211_v47, %v210_v46  ;;  %v213_v56 = vld [vmem:[#allocation2 + $0xf8] sm:$0xff]  ;;  %v287_v58 = vld [vmem:[#allocation2 + $0x100] sm:$0xff]  ;;  %v288_v59 = vld [vmem:[#allocation2 + $0x108] sm:$0xff] }
  0x20   :  { %563 = vmatpush3.bf16.msra.mxu1 %v562_v12  ;;  %v601_v57 = vpack.c.bf16 %v213_v56, %v212_v55  ;;  %v289_v60 = vld [vmem:[#allocation2 + $0x110] sm:$0xff]  ;;  %v604_v61 = vpack.c.bf16 %v288_v59, %v287_v58  ;;  %v290_v62 = vld [vmem:[#allocation2 + $0x118] sm:$0xff]  ;;  %v291_v2 = vld [vmem:[#allocation2 + $0x120] sm:$0xff] }
  0x21   :  { %564 = vmatprep.subr.bf16.mxu1 %v687_v1  ;;  %584 = vmatpush3.bf16.msra.mxu0 %v583_v33  ;;  %v607_v63 = vpack.c.bf16 %v290_v62, %v289_v60  ;;  %v292_v3 = vld [vmem:[#allocation2 + $0x128] sm:$0xff]  ;;  %v294_v5 = vld [vmem:[#allocation2 + $0x138] sm:$0xff]  ;;  %v295_v7 = vld [vmem:[#allocation2 + $0x140] sm:$0xff] }
  0x22   :  { %585 = vmatprep.subr.bf16.mxu0 %v687_v1  ;;  %v610_v4 = vpack.c.bf16 %v292_v3, %v291_v2  ;;  %v296_v8 = vld [vmem:[#allocation2 + $0x148] sm:$0xff]  ;;  %v297_v10 = vld [vmem:[#allocation2 + $0x150] sm:$0xff]  ;;  %v298_v11 = vld [vmem:[#allocation2 + $0x158] sm:$0xff] }
  0x23   :  { %v616_v9 = vpack.c.bf16 %v296_v8, %v295_v7  ;;  %v619_v12 = vpack.c.bf16 %v298_v11, %v297_v10  ;;  %v299_v13 = vld [vmem:[#allocation2 + $0x160] sm:$0xff]  ;;  %v300_v14 = vld [vmem:[#allocation2 + $0x168] sm:$0xff]  ;;  %v301_v20 = vld [vmem:[#allocation2 + $0x170] sm:$0xff] }
  0x24   :  { %566 = vmatpush3.bf16.msra.mxu1 %v565_v15  ;;  %v622_v15 = vpack.c.bf16 %v300_v14, %v299_v13 }
  0x25   :  { %567 = vmatprep.subr.bf16.mxu1 %v687_v1  ;;  %587 = vmatpush3.bf16.msra.mxu0 %v586_v36 }
  0x26   :  { %588 = vmatprep.subr.bf16.mxu0 %v687_v1 }
  0x28   :  { %569 = vmatpush3.bf16.msra.mxu1 %v568_v18 }
  0x29   :  { %570 = vmatprep.subr.bf16.mxu1 %v687_v1  ;;  %590 = vmatpush3.bf16.msra.mxu0 %v589_v39 }
  0x2a   :  { %591 = vmatprep.subr.bf16.mxu0 %v687_v1 }
  0x2c   :  { %572 = vmatpush3.bf16.msra.mxu1 %v571_v21  ;;  %v302_v21 = vld [vmem:[#allocation2 + $0x178] sm:$0xff] }
  0x2d   :  { %573 = vmatprep.subr.bf16.mxu1 %v687_v1  ;;  %593 = vmatpush3.bf16.msra.mxu0 %v592_v42  ;;  %v625_v22 = vpack.c.bf16 %v302_v21, %v301_v20 }
  0x2e   :  { %594 = vmatprep.subr.bf16.mxu0 %v687_v1 }
  0x30   :  { %575 = vmatpush3.bf16.msra.mxu1 %v574_v24 }
  0x31   :  { %576 = vmatprep.subr.bf16.mxu1 %v687_v1  ;;  %596 = vmatpush3.bf16.msra.mxu0 %v595_v45 }
  0x32   :  { %597 = vmatprep.subr.bf16.mxu0 %v687_v1 }
  0x34   :  { %578 = vmatpush3.bf16.msra.mxu1 %v577_v27 }
  0x35   :  { %603 = vmatprep.subr.bf16.mxu1 %v687_v1  ;;  %599 = vmatpush3.bf16.msra.mxu0 %v598_v48 }
  0x36   :  { %600 = vmatprep.subr.bf16.mxu0 %v687_v1 }
  0x39   :  { %602 = vmatpush3.bf16.msra.mxu0 %v601_v57 }
  0xea   :  { %v105_v52 = vpop.f32.mrb[0].mxu0 }
  0xeb   :  { %v106_v53 = vadd.f32 %v105_v52, %v32_v51  ;;  %v449_v54 = vpop.f32.mrb[1].mxu0 }
  0xed   :  { %483 = vmatmul.mubr.f32.vlgmr.msra.gmra.mrb[0].mxu1 %v106_v53 }
  0xee   :  { %552 = vmatprep.mubr.msk.f32.mxu1 %vm686_vm0, %v685_v0  ;;  %605 = vmatpush3.bf16.msra.mxu1 %v604_v61  ;;  %v293_v0 = vld [vmem:[#allocation2 + $0x130] sm:$0xff] }
  0xef   :  { %606 = vmatprep.subr.bf16.mxu1 %v687_v1  ;;  %v613_v6 = vpack.c.bf16 %v294_v5, %v293_v0 }
  0xf2   :  { %608 = vmatpush3.bf16.msra.mxu1 %v607_v63 }
  0xf3   :  { %609 = vmatprep.subr.bf16.mxu1 %v687_v1 }
  0xf6   :  { %611 = vmatpush3.bf16.msra.mxu1 %v610_v4 }
  0xf7   :  { %612 = vmatprep.subr.bf16.mxu1 %v687_v1 }
  0xfa   :  { %614 = vmatpush3.bf16.msra.mxu1 %v613_v6 }
  0xfb   :  { %615 = vmatprep.subr.bf16.mxu1 %v687_v1 }
  0xfe   :  { %617 = vmatpush3.bf16.msra.mxu1 %v616_v9 }
  0xff   :  { %618 = vmatprep.subr.bf16.mxu1 %v687_v1 }
 0x102   :  { %620 = vmatpush3.bf16.msra.mxu1 %v619_v12 }
 0x103   :  { %621 = vmatprep.subr.bf16.mxu1 %v687_v1 }
 0x106   :  { %623 = vmatpush3.bf16.msra.mxu1 %v622_v15 }
 0x107   :  { %624 = vmatprep.subr.bf16.mxu1 %v687_v1 }
 0x10a   :  { %626 = vmatpush3.bf16.msra.mxu1 %v625_v22 }
 0x1c0   :  { %v191_v16 = vpop.f32.mrb[0].mxu1 }
 0x1c1   :  { %v195_v17 = vmax.f32 %v191_v16, 0.0  ;;  %v484_v18 = vpop.f32.mrb[1].mxu1 }
 0x1c3   :  { %v196_v19 = vadd.f32 %v195_v17, %v106_v53 }
 0x1c5   :  { %518 = vmatmul.mubr.f32.vlgmr.msra.gmra.mrb[2].mxu0 %v196_v19 }
 0x298   :  { %v280_v23 = vpop.f32.mrb[2].mxu0 }
 0x299   :  { %v284_v24 = vmax.f32 %v280_v23, 0.0  ;;  %v519_v25 = vpop.f32.mrb[3].mxu0 }
 0x29b   :  { %v285_v26 = vadd.f32 %v284_v24, %v196_v19 }
 0x29d   :  { %553 = vmatmul.mubr.f32.vlgmr.msra.gmra.mrb[2].mxu1 %v285_v26 }
 0x370   :  { %v369_v27 = vpop.f32.mrb[2].mxu1 }
 0x371   :  { %v373_v28 = vmax.f32 %v369_v27, 0.0  ;;  %v554_v29 = vpop.f32.mrb[3].mxu1 }
 0x373   :  { %v374_v1 = vadd.f32 %v373_v28, %v285_v26 }
 0x375   :  { %375 = vst [vmem:[#allocation5] sm:$0xff] %v374_v1 }
 0x376   :  { %667 = shalt.err (!%p664_p12)
}
 0x377   :  { %s668_s5 = scalar_lea.hbm %s776_s3, 128 }
 0x378   :  { %p669_p13 = scmp.ne.s32.totalorder %s776_s3, %s668_s5  ;;  %p672_p0 = scmp.lt.u32.totalorder %s668_s5, %s776_s3 }
 0x37a   :  { %p674_p1 = pnand %p672_p0, %p669_p13 }
 0x37c   :  { %677 = shalt.err (!%p674_p1)
}
 0x37d   :  { %385 = dma.vmem_to_hbm [thread:$0]  %s383_s1, 128, %s776_s3, [#allocation4]  }
 0x37e   :  { %680 = dma.done.wait [#allocation4], 128  }
 0x37f   :  { %681 = vsyncadd [#allocation4], 4294967168 }
 0x380   :  { %389 = vsyncpa [#allocation3], 1 }
 0x381   :  { %390 = vsyncpa [#allocation4], 1 }

</bundles_post_ra>
